<compile_context>
chip_gen: v7x
topology: tpu7x:2x2x1
jax: 0.10.0
libtpu: 0.0.40
codegen_flags: <defaults>
</compile_context>

<pallas_src>
import jax
import jax.numpy as jnp
from jax.experimental import pallas as pl
from jax.experimental.pallas import tpu as pltpu


# ---------------------------------------------------------------------------
# GELU (erf-exact, matches torch.nn.GELU() default), VALU-lean formulation.
# 0.5-folded Abramowitz & Stegun 7.1.26 coefficients (|err| <= ~1.5e-7).
_P_SQ2 = 0.3275911 * 0.7071067811865476  # p / sqrt(2), folded
_A1 = 0.254829592 * 0.5
_A2 = -0.284496736 * 0.5
_A3 = 1.421413741 * 0.5
_A4 = -1.453152027 * 0.5
_A5 = 1.061405429 * 0.5


def _gelu_erf(x):
    """gelu(x) = x * [0.5*(1 + erf(x/sqrt(2)))], computed as x * where(x>=0, 1-q, q)
    with q = 0.5*poly(t)*exp(-x^2/2), t = 1/(1 + (p/sqrt(2))*|x|).

    Divide -> EUP approx reciprocal + one Newton step (f32-level accuracy);
    exp -> EUP; everything else is a short VPU chain with folded constants.
    """
    ax = jnp.abs(x)
    d = 1.0 + _P_SQ2 * ax
    t = pl.reciprocal(d, approx=True)
    t = t * (2.0 - d * t)  # one Newton refinement of 1/d
    poly = ((((_A5 * t + _A4) * t + _A3) * t + _A2) * t + _A1) * t
    q = poly * jnp.exp((-0.5 * x) * x)  # = 0.5 * poly * exp(-x^2/2)
    return x * jnp.where(x >= 0.0, 1.0 - q, q)


# ---------------------------------------------------------------------------
# Kernels.
def _make_ffn_kernel(num_hidden_chunks):
    if num_hidden_chunks == 1:
        # Weights fully VMEM-resident: straight-line fused FFN, no scratch.
        def kernel(x_ref, w1_ref, b1_ref, w2_ref, b2_ref, o_ref):
            h = jnp.dot(x_ref[...], w1_ref[...],
                        preferred_element_type=jnp.float32)
            h = _gelu_erf(h + b1_ref[...])
            y = jnp.dot(h.astype(w2_ref.dtype), w2_ref[...],
                        preferred_element_type=jnp.float32)
            o_ref[...] = (y + b2_ref[...]).astype(o_ref.dtype)

        return kernel

    # Hidden axis streamed in chunks: accumulate partial second-matmul results
    # into an f32 VMEM scratch; write the output tile once, on the last chunk.
    def kernel(x_ref, w1_ref, b1_ref, w2_ref, b2_ref, o_ref, acc_ref):
        k = pl.program_id(1)
        h = jnp.dot(x_ref[...], w1_ref[...],
                    preferred_element_type=jnp.float32)
        h = _gelu_erf(h + b1_ref[...])
        part = jnp.dot(h.astype(w2_ref.dtype), w2_ref[...],
                       preferred_element_type=jnp.float32)

        @pl.when(k == 0)
        def _():
            acc_ref[...] = part

        @pl.when(k > 0)
        def _():
            acc_ref[...] += part

        @pl.when(k == num_hidden_chunks - 1)
        def _():
            o_ref[...] = (acc_ref[...] + b2_ref[...]).astype(o_ref.dtype)

    return kernel


# ---------------------------------------------------------------------------
# Sizing helpers.
def _vmem_limit_bytes():
    """Generation-aware VMEM budget: ~3/4 of physical, capped at 100 MiB
    (=> ~96 MiB on v5e/v6e with 128 MiB, ~48 MiB on v7x with 64 MiB)."""
    try:
        cap = int(pltpu.get_tpu_info().vmem_capacity_bytes)
    except Exception:  # pragma: no cover - conservative (v7x-sized) fallback
        cap = 64 * 1024 * 1024
    return min(cap * 3 // 4, 100 * 1024 * 1024)


def _choose_tm(m, target=256):
    """Row-tile height: full MXU height (256; multiple of 128 so v5e-OK),
    clipped to the (8-rounded) row count; split small inputs so the parallel
    M axis has >=2 steps when each half still fills an MXU pass (v7x 2 TCs)."""
    m8 = ((m + 7) // 8) * 8
    if m8 <= target:
        if m8 >= 256:
            return m8 // 2
        return m8
    return target


def _pick_hidden_chunk(dim_in, hidden, dim_out, tm,
                       x_bytes, w_bytes, out_bytes, budget):
    """Widest legal hidden chunk whose VMEM footprint fits `budget`.
    Returns `hidden` (fully-resident, single-buffered weights) when possible,
    otherwise the largest multiple-of-128 divisor of `hidden` that fits with
    double-buffered streamed weight chunks + the f32 accumulator."""
    # Chunk-independent VMEM: x / out tiles (double-buffered) + b2.
    fixed = (2 * tm * dim_in * x_bytes
             + 2 * tm * dim_out * out_bytes
             + dim_out * 4)

    def chunk_cost(c, nbuf):
        # w1 column-chunk + w2 row-chunk + b1 chunk (nbuf pipeline buffers)
        # plus the (tm, c) f32 GELU intermediate.
        return nbuf * c * ((dim_in + dim_out) * w_bytes + 4) + tm * c * 4

    if fixed + chunk_cost(hidden, 1) <= budget:
        return hidden  # fully-resident fast path
    if hidden % 128 == 0:
        streamed_fixed = fixed + tm * dim_out * 4  # + f32 accumulator scratch
        for nlanes in range(hidden // 128, 0, -1):
            c = nlanes * 128
            if hidden % c == 0 and streamed_fixed + chunk_cost(c, 2) <= budget:
                return c
    # TODO(synk): mask ragged hidden tails in-kernel so arbitrary chunk widths
    # are legal; until then fall back to the fully-resident path.
    return hidden


# ---------------------------------------------------------------------------
# Public wrapper.
def feed_forward(x, w1, b1, w2, b2, *, block_rows=None, hidden_chunk=None):
    """Pallas implementation of FeedForward.forward (dropout==0 -> identity).

    x:  (..., dim_in)
    w1: (dim_in, hidden)   b1: (hidden,)
    w2: (hidden, dim_out)  b2: (dim_out,)
    returns (..., dim_out)
    """
    lead = x.shape[:-1]
    dim_in = x.shape[-1]
    hidden = w1.shape[1]
    dim_out = w2.shape[1]
    assert w1.shape == (dim_in, hidden) and b1.shape == (hidden,)
    assert w2.shape == (hidden, dim_out) and b2.shape == (dim_out,)

    m = 1
    for d in lead:
        m *= d
    x2 = x.reshape(m, dim_in)  # layout-preserving reshape: no HBM copy

    m8 = ((m + 7) // 8) * 8
    if block_rows is None:
        tm = _choose_tm(m)
    else:
        tm = max(8, min(((block_rows + 7) // 8) * 8, m8))

    vmem_limit = _vmem_limit_bytes()
    budget = vmem_limit - (2 << 20)  # headroom for Mosaic internal scratch
    if hidden_chunk is None:
        chunk = _pick_hidden_chunk(dim_in, hidden, dim_out, tm,
                                   x.dtype.itemsize, w1.dtype.itemsize,
                                   x.dtype.itemsize, budget)
    else:
        chunk = hidden_chunk
        assert chunk == hidden or (chunk % 128 == 0 and hidden % chunk == 0), (
            "hidden_chunk must equal hidden or be a multiple-of-128 divisor")

    nm = -(-m // tm)          # ragged last row tile handled by block clipping
    nk = hidden // chunk      # chunk always divides hidden

    # Constant-index blocks need only a single buffer on the resident path.
    w_kwargs = dict(pipeline_mode=pl.Buffered(1)) if nk == 1 else {}

    kernel = _make_ffn_kernel(nk)
    scratch = [] if nk == 1 else [pltpu.VMEM((tm, dim_out), jnp.float32)]

    out = pl.pallas_call(
        kernel,
        out_shape=jax.ShapeDtypeStruct((m, dim_out), x.dtype),
        grid_spec=pltpu.PrefetchScalarGridSpec(
            num_scalar_prefetch=0,
            grid=(nm, nk),
            in_specs=[
                pl.BlockSpec((tm, dim_in), lambda i, k: (i, 0)),
                pl.BlockSpec((dim_in, chunk), lambda i, k: (0, k), **w_kwargs),
                pl.BlockSpec((1, chunk), lambda i, k: (0, k), **w_kwargs),
                pl.BlockSpec((chunk, dim_out), lambda i, k: (k, 0), **w_kwargs),
                pl.BlockSpec((1, dim_out), lambda i, k: (0, 0), **w_kwargs),
            ],
            out_specs=pl.BlockSpec((tm, dim_out), lambda i, k: (i, 0)),
            scratch_shapes=scratch,
        ),
        compiler_params=pltpu.CompilerParams(
            dimension_semantics=("parallel", "arbitrary"),
            vmem_limit_bytes=vmem_limit,
        ),
    )(x2, w1, b1.reshape(1, hidden), w2, b2.reshape(1, dim_out))

    return out.reshape(*lead, dim_out)


# ---------------------------------------------------------------------------
def _reference(x, w1, b1, w2, b2):
    h = x @ w1 + b1
    h = jax.nn.gelu(h, approximate=False)  # torch.nn.GELU() default (erf)
    return h @ w2 + b2


if __name__ == "__main__":
    # Small deterministic example consistent with the module's use on token
    # sequences: x (batch=2, seq=8, dim_in=64); hidden=256; dim_out defaults
    # to dim_in.
    B, N, DIM_IN = 2, 8, 64
    HIDDEN = 256
    DIM_OUT = DIM_IN

    key = jax.random.PRNGKey(0)
    kx, kw1, kb1, kw2, kb2 = jax.random.split(key, 5)
    x = jax.random.normal(kx, (B, N, DIM_IN), dtype=jnp.float32)
    lim1 = DIM_IN ** -0.5
    lim2 = HIDDEN ** -0.5
    # PyTorch-like Linear init: uniform(-1/sqrt(fan_in), 1/sqrt(fan_in)).
    w1 = jax.random.uniform(kw1, (DIM_IN, HIDDEN), jnp.float32, -lim1, lim1)
    b1 = jax.random.uniform(kb1, (HIDDEN,), jnp.float32, -lim1, lim1)
    w2 = jax.random.uniform(kw2, (HIDDEN, DIM_OUT), jnp.float32, -lim2, lim2)
    b2 = jax.random.uniform(kb2, (DIM_OUT,), jnp.float32, -lim2, lim2)

    ref = _reference(x, w1, b1, w2, b2)
    # Tolerance covers the A&S erf approximation (<=1.5e-7/elem) amplified by
    # the hidden-dim contraction and the Newton-refined EUP reciprocal.
    ATOL = RTOL = 1e-3

    # 1) Default path: weights fully VMEM-resident (single hidden chunk).
    out = feed_forward(x, w1, b1, w2, b2)
    jax.block_until_ready(out)
    assert out.shape == (B, N, DIM_OUT)
    assert jnp.allclose(out, ref, atol=ATOL, rtol=RTOL), (
        float(jnp.max(jnp.abs(out - ref))))

    # 2) Streamed path: 2 row tiles x 2 hidden chunks (exercises the parallel
    #    M axis, the arbitrary hidden axis and the f32 accumulator).
    out2 = feed_forward(x, w1, b1, w2, b2, block_rows=8, hidden_chunk=128)
    jax.block_until_ready(out2)
    assert jnp.allclose(out2, ref, atol=ATOL, rtol=RTOL), (
        float(jnp.max(jnp.abs(out2 - ref))))

    print("KERNEL_OK")
</pallas_src>

<mosaic_0001>
module attributes {stable_mosaic.version = 11 : i64} {
  func.func @kernel(%arg0: i32, %arg1: i32, %arg2: memref<16x64xf32, #tpu.memory_space<vmem>>, %arg3: memref<64x256xf32, #tpu.memory_space<vmem>>, %arg4: memref<1x256xf32, #tpu.memory_space<vmem>>, %arg5: memref<256x64xf32, #tpu.memory_space<vmem>>, %arg6: memref<1x64xf32, #tpu.memory_space<vmem>>, %arg7: memref<16x64xf32, #tpu.memory_space<vmem>>) attributes {dimension_semantics = [#tpu.dimension_semantics<parallel>, #tpu.dimension_semantics<arbitrary>], iteration_bounds = array<i64: 1, 1>, scalar_prefetch = 0 : i64, scratch_operands = 0 : i64, tpu.core_type = #tpu.core_type<tc>, window_params = [{transform_indices = @transform_0, window_bounds = array<i64: 16, 64>}, {pipeline_mode = #tpu.pipeline_mode<synchronous>, transform_indices = @transform_1, window_bounds = array<i64: 64, 256>}, {pipeline_mode = #tpu.pipeline_mode<synchronous>, transform_indices = @transform_2, window_bounds = array<i64: 1, 256>}, {pipeline_mode = #tpu.pipeline_mode<synchronous>, transform_indices = @transform_3, window_bounds = array<i64: 256, 64>}, {pipeline_mode = #tpu.pipeline_mode<synchronous>, transform_indices = @transform_4, window_bounds = array<i64: 1, 64>}, {transform_indices = @transform_5, window_bounds = array<i64: 16, 64>}]} {
    %c0 = arith.constant 0 : index
    %c0_0 = arith.constant 0 : index
    %0 = vector.load %arg2[%c0, %c0_0] : memref<16x64xf32, #tpu.memory_space<vmem>>, vector<16x64xf32>
    %c0_1 = arith.constant 0 : index
    %c0_2 = arith.constant 0 : index
    %1 = vector.load %arg3[%c0_1, %c0_2] : memref<64x256xf32, #tpu.memory_space<vmem>>, vector<64x256xf32>
    %cst = arith.constant dense<0.000000e+00> : vector<16x256xf32>
    %2 = tpu.matmul %0, %1, %cst {dimension_numbers = #tpu.dot_dimension_numbers<[1], [0], [0], [1], [0, 0, 1, 1], [], []>} : vector<16x64xf32>, vector<64x256xf32>, vector<16x256xf32> -> vector<16x256xf32>
    %c0_3 = arith.constant 0 : index
    %c0_4 = arith.constant 0 : index
    %3 = vector.load %arg4[%c0_3, %c0_4] : memref<1x256xf32, #tpu.memory_space<vmem>>, vector<1x256xf32>
    %4 = vector.broadcast %3 : vector<1x256xf32> to vector<16x256xf32>
    %5 = arith.addf %2, %4 : vector<16x256xf32>
    %6 = math.absf %5 : vector<16x256xf32>
    %cst_5 = arith.constant 0.231641889 : f32
    %7 = vector.broadcast %cst_5 : f32 to vector<16x256xf32>
    %8 = arith.mulf %7, %6 : vector<16x256xf32>
    %cst_6 = arith.constant 1.000000e+00 : f32
    %9 = vector.broadcast %cst_6 : f32 to vector<16x256xf32>
    %10 = arith.addf %9, %8 : vector<16x256xf32>
    %11 = tpu.reciprocal %10 {approx = true} : vector<16x256xf32> -> vector<16x256xf32>
    %12 = arith.mulf %10, %11 : vector<16x256xf32>
    %cst_7 = arith.constant 2.000000e+00 : f32
    %13 = vector.broadcast %cst_7 : f32 to vector<16x256xf32>
    %14 = arith.subf %13, %12 : vector<16x256xf32>
    %15 = arith.mulf %11, %14 : vector<16x256xf32>
    %cst_8 = arith.constant 0.53070271 : f32
    %16 = vector.broadcast %cst_8 : f32 to vector<16x256xf32>
    %17 = arith.mulf %16, %15 : vector<16x256xf32>
    %cst_9 = arith.constant -0.72657603 : f32
    %18 = vector.broadcast %cst_9 : f32 to vector<16x256xf32>
    %19 = arith.addf %17, %18 : vector<16x256xf32>
    %20 = arith.mulf %19, %15 : vector<16x256xf32>
    %cst_10 = arith.constant 0.710706889 : f32
    %21 = vector.broadcast %cst_10 : f32 to vector<16x256xf32>
    %22 = arith.addf %20, %21 : vector<16x256xf32>
    %23 = arith.mulf %22, %15 : vector<16x256xf32>
    %cst_11 = arith.constant -0.142248362 : f32
    %24 = vector.broadcast %cst_11 : f32 to vector<16x256xf32>
    %25 = arith.addf %23, %24 : vector<16x256xf32>
    %26 = arith.mulf %25, %15 : vector<16x256xf32>
    %cst_12 = arith.constant 0.127414793 : f32
    %27 = vector.broadcast %cst_12 : f32 to vector<16x256xf32>
    %28 = arith.addf %26, %27 : vector<16x256xf32>
    %29 = arith.mulf %28, %15 : vector<16x256xf32>
    %cst_13 = arith.constant -5.000000e-01 : f32
    %30 = vector.broadcast %cst_13 : f32 to vector<16x256xf32>
    %31 = arith.mulf %30, %5 : vector<16x256xf32>
    %32 = arith.mulf %31, %5 : vector<16x256xf32>
    %33 = math.exp %32 : vector<16x256xf32>
    %34 = arith.mulf %29, %33 : vector<16x256xf32>
    %cst_14 = arith.constant 0.000000e+00 : f32
    %35 = vector.broadcast %cst_14 : f32 to vector<16x256xf32>
    %36 = arith.cmpf oge, %5, %35 : vector<16x256xf32>
    %cst_15 = arith.constant 1.000000e+00 : f32
    %37 = vector.broadcast %cst_15 : f32 to vector<16x256xf32>
    %38 = arith.subf %37, %34 : vector<16x256xf32>
    %39 = arith.select %36, %38, %34 : vector<16x256xi1>, vector<16x256xf32>
    %40 = arith.mulf %5, %39 : vector<16x256xf32>
    %c0_16 = arith.constant 0 : index
    %c0_17 = arith.constant 0 : index
    %41 = vector.load %arg5[%c0_16, %c0_17] : memref<256x64xf32, #tpu.memory_space<vmem>>, vector<256x64xf32>
    %cst_18 = arith.constant dense<0.000000e+00> : vector<16x64xf32>
    %42 = tpu.matmul %40, %41, %cst_18 {dimension_numbers = #tpu.dot_dimension_numbers<[1], [0], [0], [1], [0, 0, 1, 1], [], []>} : vector<16x256xf32>, vector<256x64xf32>, vector<16x64xf32> -> vector<16x64xf32>
    %c0_19 = arith.constant 0 : index
    %c0_20 = arith.constant 0 : index
    %43 = vector.load %arg6[%c0_19, %c0_20] : memref<1x64xf32, #tpu.memory_space<vmem>>, vector<1x64xf32>
    %44 = vector.broadcast %43 : vector<1x64xf32> to vector<16x64xf32>
    %45 = arith.addf %42, %44 : vector<16x64xf32>
    %c0_21 = arith.constant 0 : index
    %c0_22 = arith.constant 0 : index
    %46 = vector.load %arg7[%c0_21, %c0_22] : memref<16x64xf32, #tpu.memory_space<vmem>>, vector<16x64xf32>
    tpu.vector_store %arg7[%c0_21, %c0_22], %45 {strides = array<i32>} : memref<16x64xf32, #tpu.memory_space<vmem>>, vector<16x64xf32>,
    return
  }
  func.func @transform_0(%arg0: i32, %arg1: i32) -> (i32, i32) {
    %c0_i32 = arith.constant 0 : i32
    %c0_i32_0 = arith.constant 0 : i32
    return %arg0, %c0_i32 : i32, i32
  }
  func.func @transform_1(%arg0: i32, %arg1: i32) -> (i32, i32) {
    %c0_i32 = arith.constant 0 : i32
    %c0_i32_0 = arith.constant 0 : i32
    return %c0_i32, %arg1 : i32, i32
  }
  func.func @transform_2(%arg0: i32, %arg1: i32) -> (i32, i32) {
    %c0_i32 = arith.constant 0 : i32
    %c0_i32_0 = arith.constant 0 : i32
    return %c0_i32, %arg1 : i32, i32
  }
  func.func @transform_3(%arg0: i32, %arg1: i32) -> (i32, i32) {
    %c0_i32 = arith.constant 0 : i32
    %c0_i32_0 = arith.constant 0 : i32
    return %arg1, %c0_i32 : i32, i32
  }
  func.func @transform_4(%arg0: i32, %arg1: i32) -> (i32, i32) {
    %c0_i32 = arith.constant 0 : i32
    %c0_i32_0 = arith.constant 0 : i32
    %c0_i32_1 = arith.constant 0 : i32
    return %c0_i32, %c0_i32_0 : i32, i32
  }
  func.func @transform_5(%arg0: i32, %arg1: i32) -> (i32, i32) {
    %c0_i32 = arith.constant 0 : i32
    %c0_i32_0 = arith.constant 0 : i32
    return %arg0, %c0_i32 : i32, i32
  }
}

</mosaic_0001>

<bundles_post_ra>
// kernel: tpu_custom_call.1
= control target key start
LH: loop header
LB: loop body
LE: loop exit
PB: predicated region body
PF: predicated region fallthrough
CT: control target
= control target key end

     0   :  { %v500_v7 = vmov 0.0   ;;  %s734_s0 = inlined_call_operand.vmem [shape: f32[16,64], index: 0, kind: input, shape index: {}]   ;;  %s735_s1 = inlined_call_operand.vmem [shape: f32[64,256], index: 1, kind: input, shape index: {}]   ;;  %s736_s2 = inlined_call_operand.vmem [shape: f32[1,256], index: 2, kind: input, shape index: {}]   ;;  %s737_s3 = inlined_call_operand.vmem [shape: f32[256,64], index: 3, kind: input, shape index: {}]   ;;  %s738_s4 = inlined_call_operand.vmem [shape: f32[1,64], index: 4, kind: input, shape index: {}]   ;;  %s739_s5 = inlined_call_operand.hbm [shape: f32[16,64], index: 5, kind: output, shape index: {}]  }
   0x1   :  { %v24_v0 = vld [vmem:[%s735_s1 + $0x8] sm:$0xff]  ;;  %v26_v1 = vld [vmem:[%s735_s1 + $0x18] sm:$0xff]  ;;  %v23_v2 = vld [vmem:[%s735_s1] sm:$0xff]  ;;  %122 = vmatprep.mubr.f32.mxu0 %v500_v7 }
   0x2   :  { %v408_v3 = vpack.c.bf16 %v26_v1, %v24_v0  ;;  %v25_v4 = vld [vmem:[%s735_s1 + $0x10] sm:$0xff]  ;;  %v28_v5 = vld [vmem:[%s735_s1 + $0x28] sm:$0xff]  ;;  %v30_v6 = vld [vmem:[%s735_s1 + $0x38] sm:$0xff] }
   0x3   :  { %v410_v8 = vpack.c.bf16 %v25_v4, %v23_v2  ;;  %v412_v9 = vpack.c.bf16 %v30_v6, %v28_v5  ;;  %v27_v10 = vld [vmem:[%s735_s1 + $0x20] sm:$0xff]  ;;  %v29_v11 = vld [vmem:[%s735_s1 + $0x30] sm:$0xff]  ;;  %v32_v12 = vld [vmem:[%s735_s1 + $0x48] sm:$0xff] }
   0x4   :  { %409 = vmatprep.subr.bf16.mxu0 %v408_v3  ;;  %v34_v13 = vld [vmem:[%s735_s1 + $0x58] sm:$0xff]  ;;  %v414_v14 = vpack.c.bf16 %v29_v11, %v27_v10  ;;  %v31_v16 = vld [vmem:[%s735_s1 + $0x40] sm:$0xff]  ;;  %v33_v17 = vld [vmem:[%s735_s1 + $0x50] sm:$0xff] }
   0x5   :  { %411 = vmatpush1.bf16.msra.mxu0 %v410_v8  ;;  %v416_v15 = vpack.c.bf16 %v34_v13, %v32_v12  ;;  %v36_v18 = vld [vmem:[%s735_s1 + $0x68] sm:$0xff]  ;;  %v38_v19 = vld [vmem:[%s735_s1 + $0x78] sm:$0xff] }
   0x6   :  { %413 = vmatprep.subr.bf16.mxu0 %v412_v9 }
   0x7   :  { %10 = vsyncpa [#allocation3], 0  ;;  %v418_v20 = vpack.c.bf16 %v33_v17, %v31_v16  ;;  %v420_v21 = vpack.c.bf16 %v38_v19, %v36_v18  ;;  %v35_v22 = vld [vmem:[%s735_s1 + $0x60] sm:$0xff]  ;;  %v37_v23 = vld [vmem:[%s735_s1 + $0x70] sm:$0xff]  ;;  %vm51_vm0 = vcmask 523264   ;;  %v41_v11 = vlaneseq  ;;  %s501_s14 = smov [#allocation2]  }
   0x8   :  { %v422_v24 = vpack.c.bf16 %v37_v23, %v35_v22  ;;  %v21_v25 = vld [vmem:[%s734_s0] sm:$0xff]  ;;  %v22_v26 = vld [vmem:[%s734_s0 + $0x8] sm:$0xff]  ;;  %v253_v33 = vld [vmem:[%s737_s3 + $0x90] sm:$0xff]  ;;  %s356_s15 = sshll.u32 %s501_s14, 4  ;;  %s357_s15 = int_to_ptr.vmem [resolvable:$true] %s356_s15 }
   0x9   :  { %415 = vmatpush1.bf16.msra.mxu0 %v414_v14  ;;  %v251_v27 = vld [vmem:[%s737_s3 + $0x80] sm:$0xff]  ;;  %v252_v28 = vld [vmem:[%s737_s3 + $0x88] sm:$0xff]  ;;  %v254_v34 = vld [vmem:[%s737_s3 + $0x98] sm:$0xff]  ;;  %v42_v12 = vshrl.u32 %v41_v11, 7  ;;  %s476_s16 = scalar_lea.vmem %s357_s15, 256  ;;  %p481_p1 = scmp.lt.s32.totalorder %s357_s15, %s357_s15 }
   0xa   :  { %417 = vmatprep.subr.bf16.mxu0 %v416_v15  ;;  %v424_v29 = vpack.c.bf16 %v252_v28, %v251_v27  ;;  %v235_v30 = vld [vmem:[%s737_s3] sm:$0xff]  ;;  %v236_v31 = vld [vmem:[%s737_s3 + $0x8] sm:$0xff]  ;;  %v428_v35 = vpack.c.bf16 %v254_v34, %v253_v33  ;;  %v237_v36 = vld [vmem:[%s737_s3 + $0x10] sm:$0xff]  ;;  %p477_p0 = scmp.ne.s32.totalorder %s357_s15, %s476_s16  ;;  %p482_p2 = scmp.lt.s32.totalorder %s476_s16, %s476_s16 }
   0xb   :  { %v426_v32 = vpack.c.bf16 %v236_v31, %v235_v30  ;;  %v238_v37 = vld [vmem:[%s737_s3 + $0x18] sm:$0xff]  ;;  %v255_v39 = vld [vmem:[%s737_s3 + $0xa0] sm:$0xff]  ;;  %v256_v40 = vld [vmem:[%s737_s3 + $0xa8] sm:$0xff]  ;;  %v43_v13 = vsub.s32 0, %v42_v12  ;;  %v47_v15 = vsub.s32 1, %v42_v12 }
   0xc   :  { %425 = vmatprep.subr.bf16.mxu1 %v424_v29  ;;  %v430_v38 = vpack.c.bf16 %v238_v37, %v237_v36  ;;  %v432_v41 = vpack.c.bf16 %v256_v40, %v255_v39  ;;  %v239_v42 = vld [vmem:[%s737_s3 + $0x20] sm:$0xff]  ;;  %v240_v43 = vld [vmem:[%s737_s3 + $0x28] sm:$0xff]  ;;  %v257_v45 = vld [vmem:[%s737_s3 + $0xb0] sm:$0xff]  ;;  %p483_p3 = por %p482_p2, %p481_p1 }
   0xd   :  { %419 = vmatpush1.bf16.msra.mxu0 %v418_v20  ;;  %427 = vmatpush3.bf16.msra.mxu1 %v426_v32  ;;  %v434_v44 = vpack.c.bf16 %v240_v43, %v239_v42  ;;  %v258_v46 = vld [vmem:[%s737_s3 + $0xb8] sm:$0xff]  ;;  %v241_v47 = vld [vmem:[%s737_s3 + $0x30] sm:$0xff]  ;;  %v259_v50 = vld [vmem:[%s737_s3 + $0xc0] sm:$0xff] }
   0xe   :  { %421 = vmatprep.subr.bf16.mxu0 %v420_v21  ;;  %429 = vmatprep.subr.bf16.mxu1 %v428_v35  ;;  %v436_v48 = vpack.c.bf16 %v258_v46, %v257_v45  ;;  %v242_v49 = vld [vmem:[%s737_s3 + $0x38] sm:$0xff]  ;;  %v260_v51 = vld [vmem:[%s737_s3 + $0xc8] sm:$0xff]  ;;  %v243_v54 = vld [vmem:[%s737_s3 + $0x40] sm:$0xff]  ;;  %p484_p4 = pnand %p483_p3, %p477_p0 }
   0xf   :  { %v438_v52 = vpack.c.bf16 %v242_v49, %v241_v47  ;;  %v440_v53 = vpack.c.bf16 %v260_v51, %v259_v50  ;;  %v244_v55 = vld [vmem:[%s737_s3 + $0x48] sm:$0xff]  ;;  %v261_v56 = vld [vmem:[%s737_s3 + $0xd0] sm:$0xff]  ;;  %v262_v57 = vld [vmem:[%s737_s3 + $0xd8] sm:$0xff] }
  0x10   :  { %v442_v58 = vpack.c.bf16 %v244_v55, %v243_v54  ;;  %v444_v59 = vpack.c.bf16 %v262_v57, %v261_v56  ;;  %v245_v60 = vld [vmem:[%s737_s3 + $0x50] sm:$0xff]  ;;  %v246_v61 = vld [vmem:[%s737_s3 + $0x58] sm:$0xff]  ;;  %v263_v62 = vld [vmem:[%s737_s3 + $0xe0] sm:$0xff] }
  0x11   :  { %423 = vmatpush1.bf16.msra.mxu0 %v422_v24  ;;  %431 = vmatpush3.bf16.msra.mxu1 %v430_v38  ;;  %v264_v63 = vld [vmem:[%s737_s3 + $0xe8] sm:$0xff]  ;;  %v446_v0 = vpack.c.bf16 %v246_v61, %v245_v60  ;;  %v247_v2 = vld [vmem:[%s737_s3 + $0x60] sm:$0xff]  ;;  %v265_v4 = vld [vmem:[%s737_s3 + $0xf0] sm:$0xff] }
  0x12   :  { %433 = vmatprep.subr.bf16.mxu1 %v432_v41  ;;  %v448_v1 = vpack.c.bf16 %v264_v63, %v263_v62  ;;  %v248_v3 = vld [vmem:[%s737_s3 + $0x68] sm:$0xff]  ;;  %v266_v5 = vld [vmem:[%s737_s3 + $0xf8] sm:$0xff]  ;;  %v249_v8 = vld [vmem:[%s737_s3 + $0x70] sm:$0xff] }
  0x13   :  { %v450_v6 = vpack.c.bf16 %v248_v3, %v247_v2  ;;  %v250_v9 = vld [vmem:[%s737_s3 + $0x78] sm:$0xff]  ;;  %v39_v14 = vld [vmem:[%s736_s2] sm:$0x3] }
  0x14   :  { %367 = vmatmul.mubr.msk.f32.vlgmr.msra.gmra.mrb[0].mxu0 %vm51_vm0, %v21_v25  ;;  %v454_v10 = vpack.c.bf16 %v250_v9, %v249_v8  ;;  %v44_v16 = vrot.slane %v39_v14, %v43_v13  ;;  %v48_v17 = vrot.slane %v39_v14, %v47_v15 }
  0x15   :  { %128 = vmatprep.mubr.f32.mxu0 %v500_v7  ;;  %435 = vmatpush3.bf16.msra.mxu1 %v434_v44  ;;  %v452_v7 = vpack.c.bf16 %v266_v5, %v265_v4 }
  0x16   :  { %437 = vmatprep.subr.bf16.mxu1 %v436_v48 }
  0x18   :  { %368 = vmatmul.mubr.msk.f32.gmra.mrb[2].mxu0 %vm51_vm0, %v22_v26 }
  0x19   :  { %439 = vmatpush3.bf16.msra.mxu1 %v438_v52 }
  0x1a   :  { %441 = vmatprep.subr.bf16.mxu1 %v440_v53 }
  0x1d   :  { %443 = vmatpush3.bf16.msra.mxu1 %v442_v58 }
  0x1e   :  { %445 = vmatprep.subr.bf16.mxu1 %v444_v59 }
  0x21   :  { %447 = vmatpush3.bf16.msra.mxu1 %v446_v0 }
  0x22   :  { %449 = vmatprep.subr.bf16.mxu1 %v448_v1 }
  0x25   :  { %451 = vmatpush3.bf16.msra.mxu1 %v450_v6 }
  0x26   :  { %453 = vmatprep.subr.bf16.mxu1 %v452_v7 }
  0x29   :  { %455 = vmatpush3.bf16.msra.mxu1 %v454_v10 }
  0xe7   :  { %v124_v18 = vpop.f32.mrb[0].mxu0 }
  0xe8   :  { %v689_v19 = vadd.f32 %v124_v18, %v44_v16  ;;  %v126_v20 = vpop.f32.mrb[1].mxu0 }
  0xe9   :  { %v691_v21 = vadd.f32 %v126_v20, %v48_v17 }
  0xea   :  { %v135_v22 = vand.u32 2147483647, %v689_v19  ;;  %v199_v41 = vmul.f32 -0.5, %v689_v19  ;;  %vm219_vm1 = vcmp.ge.f32.partialorder %v689_v19, 0.0 }
  0xeb   :  { %v136_v23 = vand.u32 2147483647, %v691_v21  ;;  %v130_v24 = vpop.f32.mrb[2].mxu0  ;;  %v200_v45 = vmul.f32 -0.5, %v691_v21  ;;  %vm220_vm2 = vcmp.ge.f32.partialorder %v691_v21, 0.0 }
  0xec   :  { %v139_v25 = vmul.f32 0.23164189, %v135_v22  ;;  %v695_v26 = vadd.f32 %v130_v24, %v44_v16  ;;  %v132_v27 = vpop.f32.mrb[3].mxu0  ;;  %v203_v50 = vmul.f32 %v199_v41, %v689_v19 }
  0xed   :  { %v140_v28 = vmul.f32 0.23164189, %v136_v23  ;;  %v697_v29 = vadd.f32 %v132_v27, %v48_v17  ;;  %v204_v56 = vmul.f32 %v200_v45, %v691_v21 }
  0xee   :  { %v143_v30 = vadd.f32 1.0, %v139_v25  ;;  %v137_v31 = vand.u32 2147483647, %v695_v26  ;;  %v201_v51 = vmul.f32 -0.5, %v695_v26  ;;  %v207_v62 = vmul.f32 1.442695, %v203_v50 }
  0xef   :  { %v144_v32 = vadd.f32 1.0, %v140_v28  ;;  %v138_v33 = vand.u32 2147483647, %v697_v29  ;;  %v202_v57 = vmul.f32 -0.5, %v697_v29  ;;  %v209_v4 = vmul.f32 1.442695, %v204_v56 }
  0xf0   :  { %460 = vrcp.f32 %v143_v30  ;;  %v141_v34 = vmul.f32 0.23164189, %v137_v31  ;;  %v205_v63 = vmul.f32 %v201_v51, %v695_v26  ;;  %vm221_vm3 = vcmp.ge.f32.partialorder %v695_v26, 0.0 }
  0xf1   :  { %v142_v35 = vmul.f32 0.23164189, %v138_v33  ;;  %462 = vrcp.f32 %v144_v32  ;;  %v206_v5 = vmul.f32 %v202_v57, %v697_v29  ;;  %vm222_vm4 = vcmp.ge.f32.partialorder %v697_v29, 0.0 }
  0xf2   :  { %v145_v36 = vadd.f32 1.0, %v141_v34  ;;  %v211_v10 = vmul.f32 1.442695, %v205_v63 }
  0xf3   :  { %v146_v37 = vadd.f32 1.0, %v142_v35  ;;  %v213_v15 = vmul.f32 1.442695, %v206_v5 }
  0xf4   :  { %464 = vrcp.f32 %v145_v36 }
  0xf5   :  { %466 = vrcp.f32 %v146_v37 }
  0xf6   :  { %468 = vpow2.f32 %v207_v62 }
  0xf7   :  { %470 = vpow2.f32 %v209_v4 }
  0xf8   :  { %472 = vpow2.f32 %v211_v10 }
  0xf9   :  { %474 = vpow2.f32 %v213_v15 }
  0xfa   :  { %v461_v38 = vpop.eup %460 }
  0xfb   :  { %v151_v39 = vmul.f32 %v461_v38, %v143_v30  ;;  %v463_v40 = vpop.eup %462 }
  0xfc   :  { %v152_v43 = vmul.f32 %v463_v40, %v144_v32 }
  0xfd   :  { %v155_v42 = vsub.f32 2.0, %v151_v39 }
  0xfe   :  { %v465_v44 = vpop.eup %464  ;;  %v156_v47 = vsub.f32 2.0, %v152_v43 }
  0xff   :  { %v159_v46 = vmul.f32 %v461_v38, %v155_v42  ;;  %v153_v48 = vmul.f32 %v465_v44, %v145_v36  ;;  %v467_v49 = vpop.eup %466 }
 0x100   :  { %v160_v52 = vmul.f32 %v463_v40, %v156_v47  ;;  %v154_v54 = vmul.f32 %v467_v49, %v146_v37  ;;  %v469_v36 = vpop.eup %468 }
 0x101   :  { %v157_v53 = vsub.f32 2.0, %v153_v48  ;;  %v163_v55 = vmul.f32 0.5307027, %v159_v46  ;;  %v471_v41 = vpop.eup %470 }
 0x102   :  { %v158_v59 = vsub.f32 2.0, %v154_v54  ;;  %v164_v60 = vmul.f32 0.5307027, %v160_v52  ;;  %v473_v47 = vpop.eup %472 }
 0x103   :  { %v161_v58 = vmul.f32 %v465_v44, %v157_v53  ;;  %v167_v61 = vadd.f32 -0.72657603, %v163_v55  ;;  %v475_v51 = vpop.eup %474 }
 0x104   :  { %v162_v0 = vmul.f32 %v467_v49, %v158_v59  ;;  %v168_v1 = vadd.f32 -0.72657603, %v164_v60 }
 0x105   :  { %v171_v2 = vmul.f32 %v167_v61, %v159_v46  ;;  %v165_v3 = vmul.f32 0.5307027, %v161_v58 }
 0x106   :  { %v172_v6 = vmul.f32 %v168_v1, %v160_v52  ;;  %v166_v8 = vmul.f32 0.5307027, %v162_v0 }
 0x107   :  { %v175_v7 = vadd.f32 0.7107069, %v171_v2  ;;  %v169_v9 = vadd.f32 -0.72657603, %v165_v3 }
 0x108   :  { %v176_v11 = vadd.f32 0.7107069, %v172_v6  ;;  %v170_v13 = vadd.f32 -0.72657603, %v166_v8 }
 0x109   :  { %v179_v12 = vmul.f32 %v175_v7, %v159_v46  ;;  %v173_v14 = vmul.f32 %v169_v9, %v161_v58 }
 0x10a   :  { %v180_v16 = vmul.f32 %v176_v11, %v160_v52  ;;  %v174_v18 = vmul.f32 %v170_v13, %v162_v0 }
 0x10b   :  { %v183_v17 = vadd.f32 -0.14224836, %v179_v12  ;;  %v177_v20 = vadd.f32 0.7107069, %v173_v14 }
 0x10c   :  { %v184_v22 = vadd.f32 -0.14224836, %v180_v16  ;;  %v178_v24 = vadd.f32 0.7107069, %v174_v18 }
 0x10d   :  { %v187_v23 = vmul.f32 %v183_v17, %v159_v46  ;;  %v181_v25 = vmul.f32 %v177_v20, %v161_v58 }
 0x10e   :  { %v188_v27 = vmul.f32 %v184_v22, %v160_v52  ;;  %v182_v30 = vmul.f32 %v178_v24, %v162_v0 }
 0x10f   :  { %v191_v28 = vadd.f32 0.1274148, %v187_v23  ;;  %v185_v31 = vadd.f32 -0.14224836, %v181_v25 }
 0x110   :  { %v192_v32 = vadd.f32 0.1274148, %v188_v27  ;;  %v186_v34 = vadd.f32 -0.14224836, %v182_v30 }
 0x111   :  { %v195_v33 = vmul.f32 %v191_v28, %v159_v46  ;;  %v189_v35 = vmul.f32 %v185_v31, %v161_v58 }
 0x112   :  { %v196_v37 = vmul.f32 %v192_v32, %v160_v52  ;;  %v190_v39 = vmul.f32 %v186_v34, %v162_v0 }
 0x113   :  { %v215_v38 = vmul.f32 %v469_v36, %v195_v33  ;;  %v193_v40 = vadd.f32 0.1274148, %v189_v35 }
 0x114   :  { %v216_v42 = vmul.f32 %v471_v41, %v196_v37  ;;  %v194_v44 = vadd.f32 0.1274148, %v190_v39 }
 0x115   :  { %v223_v43 = vsub.f32 1.0, %v215_v38  ;;  %v197_v45 = vmul.f32 %v193_v40, %v161_v58 }
 0x116   :  { %v224_v48 = vsub.f32 1.0, %v216_v42  ;;  %v198_v49 = vmul.f32 %v194_v44, %v162_v0 }
 0x117   :  { %v217_v50 = vmul.f32 %v473_v47, %v197_v45  ;;  %v227_v46 = vsel %vm219_vm1, %v223_v43, %v215_v38 }
 0x118   :  { %v228_v53 = vsel %vm220_vm2, %v224_v48, %v216_v42  ;;  %v218_v52 = vmul.f32 %v475_v51, %v198_v49  ;;  %v231_v56 = vmul.f32 %v227_v46, %v689_v19  ;;  %v369_v19 = vld [vmem:[%s738_s4] ss:$0 sm:$0xff] }
 0x119   :  { %v225_v54 = vsub.f32 1.0, %v217_v50  ;;  %v232_v55 = vmul.f32 %v228_v53, %v691_v21 }
 0x11a   :  { %v226_v57 = vsub.f32 1.0, %v218_v52 }
 0x11b   :  { %338 = vmatprep.mubr.f32.mxu1 %v232_v55  ;;  %v229_v58 = vsel %vm221_vm3, %v225_v54, %v217_v50 }
 0x11c   :  { %339 = vmatmul.mubr.f32.vlgmr.msra.gmra.mrb[0].mxu1 %v231_v56  ;;  %v230_v59 = vsel %vm222_vm4, %v226_v57, %v218_v52  ;;  %v233_v61 = vmul.f32 %v229_v58, %v695_v26 }
 0x11d   :  { %v234_v60 = vmul.f32 %v230_v59, %v697_v29 }
 0x11f   :  { %343 = vmatprep.mubr.f32.mxu1 %v234_v60 }
 0x120   :  { %344 = vmatmul.mubr.f32.gmra.mrb[2].mxu1 %v233_v61 }
 0x1ef   :  { %v402_v62 = vpop.f32.mrb[0].mxu1 }
 0x1f0   :  { %v403_v21 = vpop.f32.mrb[1].mxu1 }
 0x1f1   :  { %v404_v63 = vadd.f32 %v403_v21, %v402_v62 }
 0x1f3   :  { %v341_v0 = vadd.f32 %v404_v63, %v369_v19  ;;  %v405_v1 = vpop.f32.mrb[2].mxu1 }
 0x1f4   :  { %v406_v2 = vpop.f32.mrb[3].mxu1 }
 0x1f5   :  { %349 = vst.msk [vmem:[#allocation2] sm:$0xff] %vm51_vm0, %v341_v0  ;;  %v407_v3 = vadd.f32 %v406_v2, %v405_v1 }
 0x1f7   :  { %v346_v29 = vadd.f32 %v407_v3, %v369_v19 }
 0x1f9   :  { %350 = vst.msk [vmem:[#allocation2 + $0x8] sm:$0xff] %vm51_vm0, %v346_v29 }
 0x1fa   :  { %487 = shalt.err (!%p484_p4)
}
 0x1fb   :  { %s488_s18 = scalar_lea.hbm %s739_s5, 256 }
 0x1fc   :  { %p489_p5 = scmp.ne.s32.totalorder %s739_s5, %s488_s18  ;;  %p492_p6 = scmp.lt.u32.totalorder %s488_s18, %s739_s5 }
 0x1fe   :  { %p494_p7 = pnand %p492_p6, %p489_p5 }
 0x200   :  { %497 = shalt.err (!%p494_p7)
}
 0x201   :  { %s502_s23 = smov 128   ;;  %s503_s24 = smov 8  }
 0x202   :  { %362 = dma.vmem_to_hbm [thread:$0]  %s357_s15, 256, %s739_s5, [#allocation3], %s502_s23, %s502_s23, %s503_s24  }
 0x203   :  { %498 = dma.done.wait [#allocation3], 256  }
 0x204   :  { %499 = vsyncadd [#allocation3], 4294967040 }
 0x205   :  { %366 = vsyncpa [#allocation3], 1 }

</bundles_post_ra>
